<compile_context>
chip_gen: v6e
topology: v6e:2x2x1
jax: 0.10.0
libtpu: 0.0.40
codegen_flags: <defaults>
</compile_context>

<pallas_src>
import math
import functools

import jax
import jax.numpy as jnp
from jax import lax
from jax.experimental import pallas as pl
from jax.experimental.pallas import tpu as pltpu


def _mha_kernel(scale, head_count, dim_per_head,
                key_ref, value_ref, query_ref,
                wk_ref, bk_ref, wv_ref, bv_ref, wq_ref, bq_ref,
                wf_ref, bf_ref,
                out_ref, top_ref,
                ctx_ref):
    H, d = head_count, dim_per_head
    bf16 = jnp.bfloat16

    k = key_ref[0].astype(bf16)      # [key_len,   model_dim]
    v = value_ref[0].astype(bf16)    # [key_len,   model_dim]
    q = query_ref[0].astype(bf16)    # [query_len, model_dim1]

    # Full-width projections: one MXU matmul each, f32 accumulation, bias add in f32.
    k_p = jnp.dot(k, wk_ref[...], preferred_element_type=jnp.float32) + bk_ref[...]
    v_p = jnp.dot(v, wv_ref[...], preferred_element_type=jnp.float32) + bv_ref[...]
    q_p = (jnp.dot(q, wq_ref[...], preferred_element_type=jnp.float32)
           + bq_ref[...]) * scale    # query / sqrt(dim_per_head), as in the module

    # Heads are unrolled at trace time (H is small & static) — no per-head grid steps.
    for h in range(H):
        sl = slice(h * d, (h + 1) * d)
        q_h = q_p[:, sl].astype(bf16)    # [query_len, d]
        k_h = k_p[:, sl].astype(bf16)    # [key_len,   d]
        v_h = v_p[:, sl].astype(bf16)    # [key_len,   d]

        # scores = q_h @ k_h^T, contracting on the last axes directly (no transpose copy).
        scores = lax.dot_general(
            q_h, k_h, dimension_numbers=(((1,), (1,)), ((), ())),
            preferred_element_type=jnp.float32)              # [query_len, key_len]

        # top_score = pre-softmax scores of head 0 (static, trace-time branch).
        if h == 0:
            top_ref[0] = scores.astype(top_ref.dtype)

        # Numerically-stable softmax over key_len in f32; reciprocal on the EUP.
        m = jnp.max(scores, axis=-1, keepdims=True)
        e = jnp.exp(scores - m)
        attn = e * pl.reciprocal(jnp.sum(e, axis=-1, keepdims=True), approx=True)

        # Per-head context into the corresponding slice of the f32 VMEM accumulator.
        ctx_ref[:, sl] = jnp.dot(attn.astype(bf16), v_h,
                                 preferred_element_type=jnp.float32)

    # Single final projection with K = model_dim.
    out = jnp.dot(ctx_ref[...].astype(bf16), wf_ref[...],
                  preferred_element_type=jnp.float32) + bf_ref[...]
    out_ref[0] = out.astype(out_ref.dtype)


def multi_headed_attention(key, value, query, params, head_count):
    """Pallas implementation of MultiHeadedAttention.forward (mask=None, eval mode)."""
    B, key_len, model_dim = key.shape
    _, query_len, model_dim1 = query.shape
    assert model_dim % head_count == 0
    d = model_dim // head_count
    scale = 1.0 / math.sqrt(d)

    bf16 = jnp.bfloat16
    # Weights are stored so the kernel computes x @ W + b (already transposed vs.
    # torch's Linear.weight layout).
    wk = params["wk"].astype(bf16)                                  # [model_dim,  model_dim]
    wv = params["wv"].astype(bf16)                                  # [model_dim,  model_dim]
    wq = params["wq"].astype(bf16)                                  # [model_dim1, model_dim]
    wf = params["wf"].astype(bf16)                                  # [model_dim,  model_dim1]
    bk = params["bk"].reshape(1, model_dim).astype(jnp.float32)
    bv = params["bv"].reshape(1, model_dim).astype(jnp.float32)
    bq = params["bq"].reshape(1, model_dim).astype(jnp.float32)
    bf = params["bf"].reshape(1, model_dim1).astype(jnp.float32)

    kernel = functools.partial(_mha_kernel, scale, head_count, d)

    out, top = pl.pallas_call(
        kernel,
        out_shape=(
            jax.ShapeDtypeStruct((B, query_len, model_dim1), jnp.float32),
            jax.ShapeDtypeStruct((B, query_len, key_len), jnp.float32),
        ),
        grid_spec=pltpu.PrefetchScalarGridSpec(
            num_scalar_prefetch=0,
            grid=(B,),
            in_specs=[
                pl.BlockSpec((1, key_len, model_dim), lambda b: (b, 0, 0)),     # key
                pl.BlockSpec((1, key_len, model_dim), lambda b: (b, 0, 0)),     # value
                pl.BlockSpec((1, query_len, model_dim1), lambda b: (b, 0, 0)),  # query
                pl.BlockSpec((model_dim, model_dim), lambda b: (0, 0)),         # wk (resident)
                pl.BlockSpec((1, model_dim), lambda b: (0, 0)),                 # bk
                pl.BlockSpec((model_dim, model_dim), lambda b: (0, 0)),         # wv
                pl.BlockSpec((1, model_dim), lambda b: (0, 0)),                 # bv
                pl.BlockSpec((model_dim1, model_dim), lambda b: (0, 0)),        # wq
                pl.BlockSpec((1, model_dim), lambda b: (0, 0)),                 # bq
                pl.BlockSpec((model_dim, model_dim1), lambda b: (0, 0)),        # wf
                pl.BlockSpec((1, model_dim1), lambda b: (0, 0)),                # bf
            ],
            out_specs=[
                pl.BlockSpec((1, query_len, model_dim1), lambda b: (b, 0, 0)),  # output
                pl.BlockSpec((1, query_len, key_len), lambda b: (b, 0, 0)),     # top_score
            ],
            scratch_shapes=[pltpu.VMEM((query_len, model_dim), jnp.float32)],   # ctx accumulator
        ),
        compiler_params=pltpu.CompilerParams(
            dimension_semantics=("parallel",),
        ),
    )(key, value, query, wk, bk, wv, bv, wq, bq, wf, bf)
    return out, top


def _reference(key, value, query, params, head_count):
    """Pure-JAX f32 reference mirroring the PyTorch forward (mask=None, dropout=eval)."""
    B, key_len, model_dim = key.shape
    _, query_len, model_dim1 = query.shape
    d = model_dim // head_count
    H = head_count

    def shape(x):
        return x.reshape(B, -1, H, d).transpose(0, 2, 1, 3)  # [B, H, L, d]

    k_p = key @ params["wk"] + params["bk"]
    v_p = value @ params["wv"] + params["bv"]
    q_p = query @ params["wq"] + params["bq"]
    k_s, v_s, q_s = shape(k_p), shape(v_p), shape(q_p)
    q_s = q_s / math.sqrt(d)
    scores = jnp.einsum("bhqd,bhkd->bhqk", q_s, k_s)
    top = scores[:, 0, :, :]
    attn = jax.nn.softmax(scores, axis=-1)
    ctx = jnp.einsum("bhqk,bhkd->bhqd", attn, v_s)
    ctx = ctx.transpose(0, 2, 1, 3).reshape(B, -1, H * d)
    out = ctx @ params["wf"] + params["bf"]
    return out, top


if __name__ == "__main__":
    # Small shapes consistent with the module.
    B = 2
    head_count = 4
    model_dim = 32      # key/value feature dim
    model_dim1 = 16     # query feature dim (and final output dim)
    key_len = 8
    query_len = 8

    root = jax.random.PRNGKey(0)
    keys = jax.random.split(root, 12)

    def init(k, shape, fan_in):
        bound = 1.0 / math.sqrt(fan_in)
        return jax.random.uniform(k, shape, jnp.float32, -bound, bound)

    params = {
        "wk": init(keys[0], (model_dim, model_dim), model_dim),
        "bk": init(keys[1], (model_dim,), model_dim),
        "wv": init(keys[2], (model_dim, model_dim), model_dim),
        "bv": init(keys[3], (model_dim,), model_dim),
        "wq": init(keys[4], (model_dim1, model_dim), model_dim1),
        "bq": init(keys[5], (model_dim,), model_dim1),
        "wf": init(keys[6], (model_dim, model_dim1), model_dim),
        "bf": init(keys[7], (model_dim1,), model_dim),
    }

    key = jax.random.normal(keys[8], (B, key_len, model_dim), jnp.float32)
    value = jax.random.normal(keys[9], (B, key_len, model_dim), jnp.float32)
    query = jax.random.normal(keys[10], (B, query_len, model_dim1), jnp.float32)

    out, top = multi_headed_attention(key, value, query, params, head_count)
    out = jax.block_until_ready(out)
    top = jax.block_until_ready(top)

    out_ref, top_ref = _reference(key, value, query, params, head_count)
    assert out.shape == (B, query_len, model_dim1)
    assert top.shape == (B, query_len, key_len)
    # bf16 MXU inputs + approx reciprocal -> compare with bf16-level tolerance.
    assert jnp.allclose(out, out_ref, atol=3e-2, rtol=3e-2), float(
        jnp.max(jnp.abs(out - out_ref)))
    assert jnp.allclose(top, top_ref, atol=3e-2, rtol=3e-2), float(
        jnp.max(jnp.abs(top - top_ref)))

    print("KERNEL_OK")
</pallas_src>

<mosaic_0001>
module attributes {stable_mosaic.version = 11 : i64} {
  func.func @_mha_kernel(%arg0: i32, %arg1: memref<1x8x32xf32, #tpu.memory_space<vmem>>, %arg2: memref<1x8x32xf32, #tpu.memory_space<vmem>>, %arg3: memref<1x8x16xf32, #tpu.memory_space<vmem>>, %arg4: memref<32x32xbf16, #tpu.memory_space<vmem>>, %arg5: memref<1x32xf32, #tpu.memory_space<vmem>>, %arg6: memref<32x32xbf16, #tpu.memory_space<vmem>>, %arg7: memref<1x32xf32, #tpu.memory_space<vmem>>, %arg8: memref<16x32xbf16, #tpu.memory_space<vmem>>, %arg9: memref<1x32xf32, #tpu.memory_space<vmem>>, %arg10: memref<32x16xbf16, #tpu.memory_space<vmem>>, %arg11: memref<1x16xf32, #tpu.memory_space<vmem>>, %arg12: memref<1x8x16xf32, #tpu.memory_space<vmem>>, %arg13: memref<1x8x8xf32, #tpu.memory_space<vmem>>, %arg14: memref<8x32xf32, #tpu.memory_space<vmem>>) attributes {dimension_semantics = [#tpu.dimension_semantics<parallel>], iteration_bounds = array<i64: 2>, scalar_prefetch = 0 : i64, scratch_operands = 1 : i64, tpu.core_type = #tpu.core_type<tc>, window_params = [{transform_indices = @transform_0, window_bounds = array<i64: 1, 8, 32>}, {transform_indices = @transform_1, window_bounds = array<i64: 1, 8, 32>}, {transform_indices = @transform_2, window_bounds = array<i64: 1, 8, 16>}, {pipeline_mode = #tpu.pipeline_mode<synchronous>, transform_indices = @transform_3, window_bounds = array<i64: 32, 32>}, {pipeline_mode = #tpu.pipeline_mode<synchronous>, transform_indices = @transform_4, window_bounds = array<i64: 1, 32>}, {pipeline_mode = #tpu.pipeline_mode<synchronous>, transform_indices = @transform_5, window_bounds = array<i64: 32, 32>}, {pipeline_mode = #tpu.pipeline_mode<synchronous>, transform_indices = @transform_6, window_bounds = array<i64: 1, 32>}, {pipeline_mode = #tpu.pipeline_mode<synchronous>, transform_indices = @transform_7, window_bounds = array<i64: 16, 32>}, {pipeline_mode = #tpu.pipeline_mode<synchronous>, transform_indices = @transform_8, window_bounds = array<i64: 1, 32>}, {pipeline_mode = #tpu.pipeline_mode<synchronous>, transform_indices = @transform_9, window_bounds = array<i64: 32, 16>}, {pipeline_mode = #tpu.pipeline_mode<synchronous>, transform_indices = @transform_10, window_bounds = array<i64: 1, 16>}, {transform_indices = @transform_11, window_bounds = array<i64: 1, 8, 16>}, {transform_indices = @transform_12, window_bounds = array<i64: 1, 8, 8>}]} {
    %c0 = arith.constant 0 : index
    %c0_0 = arith.constant 0 : index
    %c0_1 = arith.constant 0 : index
    %0 = vector.load %arg1[%c0, %c0_0, %c0_1] : memref<1x8x32xf32, #tpu.memory_space<vmem>>, vector<1x8x32xf32>
    %1 = vector.shape_cast %0 : vector<1x8x32xf32> to vector<8x32xf32>
    %2 = arith.truncf %1 : vector<8x32xf32> to vector<8x32xbf16>
    %c0_2 = arith.constant 0 : index
    %c0_3 = arith.constant 0 : index
    %c0_4 = arith.constant 0 : index
    %3 = vector.load %arg2[%c0_2, %c0_3, %c0_4] : memref<1x8x32xf32, #tpu.memory_space<vmem>>, vector<1x8x32xf32>
    %4 = vector.shape_cast %3 : vector<1x8x32xf32> to vector<8x32xf32>
    %5 = arith.truncf %4 : vector<8x32xf32> to vector<8x32xbf16>
    %c0_5 = arith.constant 0 : index
    %c0_6 = arith.constant 0 : index
    %c0_7 = arith.constant 0 : index
    %6 = vector.load %arg3[%c0_5, %c0_6, %c0_7] : memref<1x8x16xf32, #tpu.memory_space<vmem>>, vector<1x8x16xf32>
    %7 = vector.shape_cast %6 : vector<1x8x16xf32> to vector<8x16xf32>
    %8 = arith.truncf %7 : vector<8x16xf32> to vector<8x16xbf16>
    %c0_8 = arith.constant 0 : index
    %c0_9 = arith.constant 0 : index
    %9 = vector.load %arg4[%c0_8, %c0_9] : memref<32x32xbf16, #tpu.memory_space<vmem>>, vector<32x32xbf16>
    %cst = arith.constant dense<0.000000e+00> : vector<8x32xf32>
    %10 = tpu.matmul %2, %9, %cst {dimension_numbers = #tpu.dot_dimension_numbers<[1], [0], [0], [1], [0, 0, 1, 1], [], []>} : vector<8x32xbf16>, vector<32x32xbf16>, vector<8x32xf32> -> vector<8x32xf32>
    %c0_10 = arith.constant 0 : index
    %c0_11 = arith.constant 0 : index
    %11 = vector.load %arg5[%c0_10, %c0_11] : memref<1x32xf32, #tpu.memory_space<vmem>>, vector<1x32xf32>
    %12 = vector.broadcast %11 : vector<1x32xf32> to vector<8x32xf32>
    %13 = arith.addf %10, %12 : vector<8x32xf32>
    %c0_12 = arith.constant 0 : index
    %c0_13 = arith.constant 0 : index
    %14 = vector.load %arg6[%c0_12, %c0_13] : memref<32x32xbf16, #tpu.memory_space<vmem>>, vector<32x32xbf16>
    %cst_14 = arith.constant dense<0.000000e+00> : vector<8x32xf32>
    %15 = tpu.matmul %5, %14, %cst_14 {dimension_numbers = #tpu.dot_dimension_numbers<[1], [0], [0], [1], [0, 0, 1, 1], [], []>} : vector<8x32xbf16>, vector<32x32xbf16>, vector<8x32xf32> -> vector<8x32xf32>
    %c0_15 = arith.constant 0 : index
    %c0_16 = arith.constant 0 : index
    %16 = vector.load %arg7[%c0_15, %c0_16] : memref<1x32xf32, #tpu.memory_space<vmem>>, vector<1x32xf32>
    %17 = vector.broadcast %16 : vector<1x32xf32> to vector<8x32xf32>
    %18 = arith.addf %15, %17 : vector<8x32xf32>
    %c0_17 = arith.constant 0 : index
    %c0_18 = arith.constant 0 : index
    %19 = vector.load %arg8[%c0_17, %c0_18] : memref<16x32xbf16, #tpu.memory_space<vmem>>, vector<16x32xbf16>
    %cst_19 = arith.constant dense<0.000000e+00> : vector<8x32xf32>
    %20 = tpu.matmul %8, %19, %cst_19 {dimension_numbers = #tpu.dot_dimension_numbers<[1], [0], [0], [1], [0, 0, 1, 1], [], []>} : vector<8x16xbf16>, vector<16x32xbf16>, vector<8x32xf32> -> vector<8x32xf32>
    %c0_20 = arith.constant 0 : index
    %c0_21 = arith.constant 0 : index
    %21 = vector.load %arg9[%c0_20, %c0_21] : memref<1x32xf32, #tpu.memory_space<vmem>>, vector<1x32xf32>
    %22 = vector.broadcast %21 : vector<1x32xf32> to vector<8x32xf32>
    %23 = arith.addf %20, %22 : vector<8x32xf32>
    %cst_22 = arith.constant 0.353553385 : f32
    %24 = vector.broadcast %cst_22 : f32 to vector<8x32xf32>
    %25 = arith.mulf %23, %24 : vector<8x32xf32>
    %26 = vector.extract_strided_slice %25 {offsets = [0, 0], sizes = [8, 8], strides = [1, 1]} : vector<8x32xf32> to vector<8x8xf32>
    %27 = arith.truncf %26 : vector<8x8xf32> to vector<8x8xbf16>
    %28 = vector.extract_strided_slice %13 {offsets = [0, 0], sizes = [8, 8], strides = [1, 1]} : vector<8x32xf32> to vector<8x8xf32>
    %29 = arith.truncf %28 : vector<8x8xf32> to vector<8x8xbf16>
    %30 = vector.extract_strided_slice %18 {offsets = [0, 0], sizes = [8, 8], strides = [1, 1]} : vector<8x32xf32> to vector<8x8xf32>
    %31 = arith.truncf %30 : vector<8x8xf32> to vector<8x8xbf16>
    %cst_23 = arith.constant dense<0.000000e+00> : vector<8x8xf32>
    %32 = tpu.matmul %27, %29, %cst_23 {dimension_numbers = #tpu.dot_dimension_numbers<[1], [1], [0], [0], [0, 0, 1, 0], [], []>} : vector<8x8xbf16>, vector<8x8xbf16>, vector<8x8xf32> -> vector<8x8xf32>
    %c0_24 = arith.constant 0 : index
    %c0_25 = arith.constant 0 : index
    %c0_26 = arith.constant 0 : index
    %33 = vector.load %arg13[%c0_24, %c0_25, %c0_26] : memref<1x8x8xf32, #tpu.memory_space<vmem>>, vector<1x8x8xf32>
    %34 = vector.shape_cast %33 : vector<1x8x8xf32> to vector<8x8xf32>
    %35 = vector.shape_cast %32 : vector<8x8xf32> to vector<1x8x8xf32>
    tpu.vector_store %arg13[%c0_24, %c0_25, %c0_26], %35 {strides = array<i32>} : memref<1x8x8xf32, #tpu.memory_space<vmem>>, vector<1x8x8xf32>,
    %cst_27 = arith.constant dense<0xFF800000> : vector<8xf32>
    %36 = vector.multi_reduction <maximumf>, %32, %cst_27 [1] : vector<8x8xf32> to vector<8xf32>
    %37 = vector.shape_cast %36 : vector<8xf32> to vector<8x1xf32>
    %38 = vector.broadcast %37 : vector<8x1xf32> to vector<8x8xf32>
    %39 = arith.subf %32, %38 : vector<8x8xf32>
    %40 = math.exp %39 : vector<8x8xf32>
    %cst_28 = arith.constant dense<0.000000e+00> : vector<8xf32>
    %41 = vector.multi_reduction <add>, %40, %cst_28 [1] : vector<8x8xf32> to vector<8xf32>
    %42 = vector.shape_cast %41 : vector<8xf32> to vector<8x1xf32>
    %43 = tpu.reciprocal %42 {approx = true} : vector<8x1xf32> -> vector<8x1xf32>
    %44 = vector.broadcast %43 : vector<8x1xf32> to vector<8x8xf32>
    %45 = arith.mulf %40, %44 : vector<8x8xf32>
    %46 = arith.truncf %45 : vector<8x8xf32> to vector<8x8xbf16>
    %cst_29 = arith.constant dense<0.000000e+00> : vector<8x8xf32>
    %47 = tpu.matmul %46, %31, %cst_29 {dimension_numbers = #tpu.dot_dimension_numbers<[1], [0], [0], [1], [0, 0, 1, 1], [], []>} : vector<8x8xbf16>, vector<8x8xbf16>, vector<8x8xf32> -> vector<8x8xf32>
    %c0_30 = arith.constant 0 : index
    %c0_31 = arith.constant 0 : index
    %48 = vector.load %arg14[%c0_30, %c0_31] : memref<8x32xf32, #tpu.memory_space<vmem>>, vector<8x8xf32>
    tpu.vector_store %arg14[%c0_30, %c0_31], %47 {strides = array<i32>} : memref<8x32xf32, #tpu.memory_space<vmem>>, vector<8x8xf32>,
    %49 = vector.extract_strided_slice %25 {offsets = [0, 8], sizes = [8, 8], strides = [1, 1]} : vector<8x32xf32> to vector<8x8xf32>
    %50 = arith.truncf %49 : vector<8x8xf32> to vector<8x8xbf16>
    %51 = vector.extract_strided_slice %13 {offsets = [0, 8], sizes = [8, 8], strides = [1, 1]} : vector<8x32xf32> to vector<8x8xf32>
    %52 = arith.truncf %51 : vector<8x8xf32> to vector<8x8xbf16>
    %53 = vector.extract_strided_slice %18 {offsets = [0, 8], sizes = [8, 8], strides = [1, 1]} : vector<8x32xf32> to vector<8x8xf32>
    %54 = arith.truncf %53 : vector<8x8xf32> to vector<8x8xbf16>
    %cst_32 = arith.constant dense<0.000000e+00> : vector<8x8xf32>
    %55 = tpu.matmul %50, %52, %cst_32 {dimension_numbers = #tpu.dot_dimension_numbers<[1], [1], [0], [0], [0, 0, 1, 0], [], []>} : vector<8x8xbf16>, vector<8x8xbf16>, vector<8x8xf32> -> vector<8x8xf32>
    %cst_33 = arith.constant dense<0xFF800000> : vector<8xf32>
    %56 = vector.multi_reduction <maximumf>, %55, %cst_33 [1] : vector<8x8xf32> to vector<8xf32>
    %57 = vector.shape_cast %56 : vector<8xf32> to vector<8x1xf32>
    %58 = vector.broadcast %57 : vector<8x1xf32> to vector<8x8xf32>
    %59 = arith.subf %55, %58 : vector<8x8xf32>
    %60 = math.exp %59 : vector<8x8xf32>
    %cst_34 = arith.constant dense<0.000000e+00> : vector<8xf32>
    %61 = vector.multi_reduction <add>, %60, %cst_34 [1] : vector<8x8xf32> to vector<8xf32>
    %62 = vector.shape_cast %61 : vector<8xf32> to vector<8x1xf32>
    %63 = tpu.reciprocal %62 {approx = true} : vector<8x1xf32> -> vector<8x1xf32>
    %64 = vector.broadcast %63 : vector<8x1xf32> to vector<8x8xf32>
    %65 = arith.mulf %60, %64 : vector<8x8xf32>
    %66 = arith.truncf %65 : vector<8x8xf32> to vector<8x8xbf16>
    %cst_35 = arith.constant dense<0.000000e+00> : vector<8x8xf32>
    %67 = tpu.matmul %66, %54, %cst_35 {dimension_numbers = #tpu.dot_dimension_numbers<[1], [0], [0], [1], [0, 0, 1, 1], [], []>} : vector<8x8xbf16>, vector<8x8xbf16>, vector<8x8xf32> -> vector<8x8xf32>
    %c0_36 = arith.constant 0 : index
    %c8 = arith.constant 8 : index
    %68 = vector.load %arg14[%c0_36, %c8] : memref<8x32xf32, #tpu.memory_space<vmem>>, vector<8x8xf32>
    tpu.vector_store %arg14[%c0_36, %c8], %67 {strides = array<i32>} : memref<8x32xf32, #tpu.memory_space<vmem>>, vector<8x8xf32>,
    %69 = vector.extract_strided_slice %25 {offsets = [0, 16], sizes = [8, 8], strides = [1, 1]} : vector<8x32xf32> to vector<8x8xf32>
    %70 = arith.truncf %69 : vector<8x8xf32> to vector<8x8xbf16>
    %71 = vector.extract_strided_slice %13 {offsets = [0, 16], sizes = [8, 8], strides = [1, 1]} : vector<8x32xf32> to vector<8x8xf32>
    %72 = arith.truncf %71 : vector<8x8xf32> to vector<8x8xbf16>
    %73 = vector.extract_strided_slice %18 {offsets = [0, 16], sizes = [8, 8], strides = [1, 1]} : vector<8x32xf32> to vector<8x8xf32>
    %74 = arith.truncf %73 : vector<8x8xf32> to vector<8x8xbf16>
    %cst_37 = arith.constant dense<0.000000e+00> : vector<8x8xf32>
    %75 = tpu.matmul %70, %72, %cst_37 {dimension_numbers = #tpu.dot_dimension_numbers<[1], [1], [0], [0], [0, 0, 1, 0], [], []>} : vector<8x8xbf16>, vector<8x8xbf16>, vector<8x8xf32> -> vector<8x8xf32>
    %cst_38 = arith.constant dense<0xFF800000> : vector<8xf32>
    %76 = vector.multi_reduction <maximumf>, %75, %cst_38 [1] : vector<8x8xf32> to vector<8xf32>
    %77 = vector.shape_cast %76 : vector<8xf32> to vector<8x1xf32>
    %78 = vector.broadcast %77 : vector<8x1xf32> to vector<8x8xf32>
    %79 = arith.subf %75, %78 : vector<8x8xf32>
    %80 = math.exp %79 : vector<8x8xf32>
    %cst_39 = arith.constant dense<0.000000e+00> : vector<8xf32>
    %81 = vector.multi_reduction <add>, %80, %cst_39 [1] : vector<8x8xf32> to vector<8xf32>
    %82 = vector.shape_cast %81 : vector<8xf32> to vector<8x1xf32>
    %83 = tpu.reciprocal %82 {approx = true} : vector<8x1xf32> -> vector<8x1xf32>
    %84 = vector.broadcast %83 : vector<8x1xf32> to vector<8x8xf32>
    %85 = arith.mulf %80, %84 : vector<8x8xf32>
    %86 = arith.truncf %85 : vector<8x8xf32> to vector<8x8xbf16>
    %cst_40 = arith.constant dense<0.000000e+00> : vector<8x8xf32>
    %87 = tpu.matmul %86, %74, %cst_40 {dimension_numbers = #tpu.dot_dimension_numbers<[1], [0], [0], [1], [0, 0, 1, 1], [], []>} : vector<8x8xbf16>, vector<8x8xbf16>, vector<8x8xf32> -> vector<8x8xf32>
    %c0_41 = arith.constant 0 : index
    %c16 = arith.constant 16 : index
    %88 = vector.load %arg14[%c0_41, %c16] : memref<8x32xf32, #tpu.memory_space<vmem>>, vector<8x8xf32>
    tpu.vector_store %arg14[%c0_41, %c16], %87 {strides = array<i32>} : memref<8x32xf32, #tpu.memory_space<vmem>>, vector<8x8xf32>,
    %89 = vector.extract_strided_slice %25 {offsets = [0, 24], sizes = [8, 8], strides = [1, 1]} : vector<8x32xf32> to vector<8x8xf32>
    %90 = arith.truncf %89 : vector<8x8xf32> to vector<8x8xbf16>
    %91 = vector.extract_strided_slice %13 {offsets = [0, 24], sizes = [8, 8], strides = [1, 1]} : vector<8x32xf32> to vector<8x8xf32>
    %92 = arith.truncf %91 : vector<8x8xf32> to vector<8x8xbf16>
    %93 = vector.extract_strided_slice %18 {offsets = [0, 24], sizes = [8, 8], strides = [1, 1]} : vector<8x32xf32> to vector<8x8xf32>
    %94 = arith.truncf %93 : vector<8x8xf32> to vector<8x8xbf16>
    %cst_42 = arith.constant dense<0.000000e+00> : vector<8x8xf32>
    %95 = tpu.matmul %90, %92, %cst_42 {dimension_numbers = #tpu.dot_dimension_numbers<[1], [1], [0], [0], [0, 0, 1, 0], [], []>} : vector<8x8xbf16>, vector<8x8xbf16>, vector<8x8xf32> -> vector<8x8xf32>
    %cst_43 = arith.constant dense<0xFF800000> : vector<8xf32>
    %96 = vector.multi_reduction <maximumf>, %95, %cst_43 [1] : vector<8x8xf32> to vector<8xf32>
    %97 = vector.shape_cast %96 : vector<8xf32> to vector<8x1xf32>
    %98 = vector.broadcast %97 : vector<8x1xf32> to vector<8x8xf32>
    %99 = arith.subf %95, %98 : vector<8x8xf32>
    %100 = math.exp %99 : vector<8x8xf32>
    %cst_44 = arith.constant dense<0.000000e+00> : vector<8xf32>
    %101 = vector.multi_reduction <add>, %100, %cst_44 [1] : vector<8x8xf32> to vector<8xf32>
    %102 = vector.shape_cast %101 : vector<8xf32> to vector<8x1xf32>
    %103 = tpu.reciprocal %102 {approx = true} : vector<8x1xf32> -> vector<8x1xf32>
    %104 = vector.broadcast %103 : vector<8x1xf32> to vector<8x8xf32>
    %105 = arith.mulf %100, %104 : vector<8x8xf32>
    %106 = arith.truncf %105 : vector<8x8xf32> to vector<8x8xbf16>
    %cst_45 = arith.constant dense<0.000000e+00> : vector<8x8xf32>
    %107 = tpu.matmul %106, %94, %cst_45 {dimension_numbers = #tpu.dot_dimension_numbers<[1], [0], [0], [1], [0, 0, 1, 1], [], []>} : vector<8x8xbf16>, vector<8x8xbf16>, vector<8x8xf32> -> vector<8x8xf32>
    %c0_46 = arith.constant 0 : index
    %c24 = arith.constant 24 : index
    %108 = vector.load %arg14[%c0_46, %c24] : memref<8x32xf32, #tpu.memory_space<vmem>>, vector<8x8xf32>
    tpu.vector_store %arg14[%c0_46, %c24], %107 {strides = array<i32>} : memref<8x32xf32, #tpu.memory_space<vmem>>, vector<8x8xf32>,
    %c0_47 = arith.constant 0 : index
    %c0_48 = arith.constant 0 : index
    %109 = vector.load %arg14[%c0_47, %c0_48] : memref<8x32xf32, #tpu.memory_space<vmem>>, vector<8x32xf32>
    %110 = arith.truncf %109 : vector<8x32xf32> to vector<8x32xbf16>
    %c0_49 = arith.constant 0 : index
    %c0_50 = arith.constant 0 : index
    %111 = vector.load %arg10[%c0_49, %c0_50] : memref<32x16xbf16, #tpu.memory_space<vmem>>, vector<32x16xbf16>
    %cst_51 = arith.constant dense<0.000000e+00> : vector<8x16xf32>
    %112 = tpu.matmul %110, %111, %cst_51 {dimension_numbers = #tpu.dot_dimension_numbers<[1], [0], [0], [1], [0, 0, 1, 1], [], []>} : vector<8x32xbf16>, vector<32x16xbf16>, vector<8x16xf32> -> vector<8x16xf32>
    %c0_52 = arith.constant 0 : index
    %c0_53 = arith.constant 0 : index
    %113 = vector.load %arg11[%c0_52, %c0_53] : memref<1x16xf32, #tpu.memory_space<vmem>>, vector<1x16xf32>
    %114 = vector.broadcast %113 : vector<1x16xf32> to vector<8x16xf32>
    %115 = arith.addf %112, %114 : vector<8x16xf32>
    %c0_54 = arith.constant 0 : index
    %c0_55 = arith.constant 0 : index
    %c0_56 = arith.constant 0 : index
    %116 = vector.load %arg12[%c0_54, %c0_55, %c0_56] : memref<1x8x16xf32, #tpu.memory_space<vmem>>, vector<1x8x16xf32>
    %117 = vector.shape_cast %116 : vector<1x8x16xf32> to vector<8x16xf32>
    %118 = vector.shape_cast %115 : vector<8x16xf32> to vector<1x8x16xf32>
    tpu.vector_store %arg12[%c0_54, %c0_55, %c0_56], %118 {strides = array<i32>} : memref<1x8x16xf32, #tpu.memory_space<vmem>>, vector<1x8x16xf32>,
    return
  }
  func.func @transform_0(%arg0: i32) -> (i32, i32, i32) {
    %c0_i32 = arith.constant 0 : i32
    %c0_i32_0 = arith.constant 0 : i32
    %c0_i32_1 = arith.constant 0 : i32
    return %arg0, %c0_i32, %c0_i32_0 : i32, i32, i32
  }
  func.func @transform_1(%arg0: i32) -> (i32, i32, i32) {
    %c0_i32 = arith.constant 0 : i32
    %c0_i32_0 = arith.constant 0 : i32
    %c0_i32_1 = arith.constant 0 : i32
    return %arg0, %c0_i32, %c0_i32_0 : i32, i32, i32
  }
  func.func @transform_2(%arg0: i32) -> (i32, i32, i32) {
    %c0_i32 = arith.constant 0 : i32
    %c0_i32_0 = arith.constant 0 : i32
    %c0_i32_1 = arith.constant 0 : i32
    return %arg0, %c0_i32, %c0_i32_0 : i32, i32, i32
  }
  func.func @transform_3(%arg0: i32) -> (i32, i32) {
    %c0_i32 = arith.constant 0 : i32
    %c0_i32_0 = arith.constant 0 : i32
    %c0_i32_1 = arith.constant 0 : i32
    return %c0_i32, %c0_i32_0 : i32, i32
  }
  func.func @transform_4(%arg0: i32) -> (i32, i32) {
    %c0_i32 = arith.constant 0 : i32
    %c0_i32_0 = arith.constant 0 : i32
    %c0_i32_1 = arith.constant 0 : i32
    return %c0_i32, %c0_i32_0 : i32, i32
  }
  func.func @transform_5(%arg0: i32) -> (i32, i32) {
    %c0_i32 = arith.constant 0 : i32
    %c0_i32_0 = arith.constant 0 : i32
    %c0_i32_1 = arith.constant 0 : i32
    return %c0_i32, %c0_i32_0 : i32, i32
  }
  func.func @transform_6(%arg0: i32) -> (i32, i32) {
    %c0_i32 = arith.constant 0 : i32
    %c0_i32_0 = arith.constant 0 : i32
    %c0_i32_1 = arith.constant 0 : i32
    return %c0_i32, %c0_i32_0 : i32, i32
  }
  func.func @transform_7(%arg0: i32) -> (i32, i32) {
    %c0_i32 = arith.constant 0 : i32
    %c0_i32_0 = arith.constant 0 : i32
    %c0_i32_1 = arith.constant 0 : i32
    return %c0_i32, %c0_i32_0 : i32, i32
  }
  func.func @transform_8(%arg0: i32) -> (i32, i32) {
    %c0_i32 = arith.constant 0 : i32
    %c0_i32_0 = arith.constant 0 : i32
    %c0_i32_1 = arith.constant 0 : i32
    return %c0_i32, %c0_i32_0 : i32, i32
  }
  func.func @transform_9(%arg0: i32) -> (i32, i32) {
    %c0_i32 = arith.constant 0 : i32
    %c0_i32_0 = arith.constant 0 : i32
    %c0_i32_1 = arith.constant 0 : i32
    return %c0_i32, %c0_i32_0 : i32, i32
  }
  func.func @transform_10(%arg0: i32) -> (i32, i32) {
    %c0_i32 = arith.constant 0 : i32
    %c0_i32_0 = arith.constant 0 : i32
    %c0_i32_1 = arith.constant 0 : i32
    return %c0_i32, %c0_i32_0 : i32, i32
  }
  func.func @transform_11(%arg0: i32) -> (i32, i32, i32) {
    %c0_i32 = arith.constant 0 : i32
    %c0_i32_0 = arith.constant 0 : i32
    %c0_i32_1 = arith.constant 0 : i32
    return %arg0, %c0_i32, %c0_i32_0 : i32, i32, i32
  }
  func.func @transform_12(%arg0: i32) -> (i32, i32, i32) {
    %c0_i32 = arith.constant 0 : i32
    %c0_i32_0 = arith.constant 0 : i32
    %c0_i32_1 = arith.constant 0 : i32
    return %arg0, %c0_i32, %c0_i32_0 : i32, i32, i32
  }
}

</mosaic_0001>

<bundles_post_ra>
// kernel: tpu_custom_call.1
= control target key start
LH: loop header
LB: loop body
LE: loop exit
PB: predicated region body
PF: predicated region fallthrough
CT: control target
= control target key end

     0   :  { %s2577_s0 = inlined_call_operand.vmem [shape: f32[2,8,32], index: 0, kind: input, shape index: {}]   ;;  %s2578_s1 = inlined_call_operand.hbm [shape: f32[2,8,32], index: 1, kind: input, shape index: {}]   ;;  %s2579_s2 = inlined_call_operand.hbm [shape: f32[2,8,16], index: 2, kind: input, shape index: {}]   ;;  %s2580_s3 = inlined_call_operand.hbm [shape: bf16[32,32], index: 3, kind: input, shape index: {}]   ;;  %s2581_s4 = inlined_call_operand.hbm [shape: f32[1,32], index: 4, kind: input, shape index: {}]   ;;  %s2582_s5 = inlined_call_operand.vmem [shape: bf16[32,32], index: 5, kind: input, shape index: {}]   ;;  %s2583_s6 = inlined_call_operand.hbm [shape: f32[1,32], index: 6, kind: input, shape index: {}]   ;;  %s2584_s7 = inlined_call_operand.hbm [shape: bf16[16,32], index: 7, kind: input, shape index: {}]   ;;  %s2585_s8 = inlined_call_operand.hbm [shape: f32[1,32], index: 8, kind: input, shape index: {}]   ;;  %s2586_s9 = inlined_call_operand.vmem [shape: bf16[32,16], index: 9, kind: input, shape index: {}]   ;;  %s2587_s10 = inlined_call_operand.vmem [shape: f32[1,16], index: 10, kind: input, shape index: {}]   ;;  %s2588_s11 = inlined_call_operand.hbm [shape: f32[2,8,16], index: 11, kind: output, shape index: {0}]   ;;  %s2589_s12 = inlined_call_operand.hbm [shape: f32[2,8,8], index: 12, kind: output, shape index: {1}]  }
   0x1   :  { %2598 = sst [smem:[#allocation28_spill]] %s2580_s3 }
   0x2   :  { %2599 = sst [smem:[#allocation29_spill]] %s2581_s4 }
   0x3   :  { %2600 = sst [smem:[#allocation30_spill]] %s2583_s6 }
   0x4   :  { %2601 = sst [smem:[#allocation31_spill]] %s2584_s7 }
   0x5   :  { %2602 = sst [smem:[#allocation32_spill]] %s2585_s8 }
   0x6   :  { %2603 = sst [smem:[#allocation33_spill]] %s2588_s11 }
   0x7   :  { %18 = vsyncpa [#allocation4], 0 }
   0x8   :  { %20 = vsyncpa [#allocation4 + $0x1], 0 }
   0x9   :  { %21 = vsyncpa [#allocation7], 0 }
   0xa   :  { %23 = vsyncpa [#allocation7 + $0x1], 0 }
   0xb   :  { %24 = vsyncpa [#allocation10], 0 }
   0xc   :  { %25 = vsyncpa [#allocation13], 0 }
   0xd   :  { %26 = vsyncpa [#allocation5], 0 }
   0xe   :  { %28 = vsyncpa [#allocation5 + $0x1], 0 }
   0xf   :  { %29 = vsyncpa [#allocation17], 0 }
  0x10   :  { %31 = vsyncpa [#allocation17 + $0x1], 0  ;;  %s2186_s21 = smov 0   ;;  %s2188_s22 = smov 0  }
  0x11   :  { %s2190_s23 = smov 0   ;;  %s2192_s24 = smov 0  }
  0x12 LB: > { %2604 = sst [smem:[#allocation25_spill]] %s2096_s23  ;;  %s2102_s25 = smov [#allocation8]   ;;  %s2100_s24 = sphi %s2192_s24, %s2632_s24   ;;  %s2096_s23 = sphi %s2190_s23, %s2634_s23   ;;  %s2092_s22 = sphi %s2188_s22, %s2636_s22   ;;  %s2088_s21 = sphi %s2186_s21, %s2635_s21  }
  0x13   : > { %s352_s26 = sshll.u32 %s2102_s25, 4  ;;  %s2207_s27 = sadd.s32 4294967295, %s2100_s24   ;;  %s353_s26 = int_to_ptr.vmem [resolvable:$true] %s352_s26 }
  0x14   : > { %p1508_p0 = scmp.ge.s32.totalorder %s2100_s24, 1  ;;  %p2591_p1 = scmp.eq.s32.totalorder %s2207_s27, 0 }
  0x15   : > { %p340_p2 = scmp.lt.s32.totalorder %s2100_s24, 3  ;;  %s2103_s29 = smov [#allocation9]  }
  0x16   : > { %s366_s30 = sshll.u32 %s2103_s29, 4  ;;  %s2104_s14 = smov [#allocation12]   ;;  %s367_s30 = int_to_ptr.vmem [resolvable:$true] %s366_s30 }
  0x17   : > { %p2212_p3 = pnand %p1508_p0, %p340_p2  ;;  %s390_s15 = sshll.u32 %s2104_s14, 4  ;;  %s2225_s15 = int_to_ptr.vmem [resolvable:$true] %s390_s15 }
  0x18   : > { %s1815_s17 = scalar_lea.vmem %s353_s26, 256  ;;  %p1823_p11 = scmp.lt.s32.totalorder %s353_s26, %s353_s26 }
  0x19   : > { %s2605_s28 = scalar_select %p2212_p3, 1, 0 }
  0x1a   : > { %p1692_p5 = pneg %p2212_p3  ;;  %p1816_p8 = scmp.ne.s32.totalorder %s353_s26, %s1815_s17 }
  0x1b   : > { %p1824_p12 = scmp.lt.s32.totalorder %s1815_s17, %s1815_s17 }
  0x1c   : > { %p2221_p6 = pnand %p1692_p5, %p2591_p1 }
  0x1d   : > { %p1825_p13 = por %p1824_p12, %p1823_p11 }
  0x1e   : > { %p2229_p7 = pneg %p2221_p6 }
  0x20   : > { %p1818_p9 = pnand %p1816_p8, %p2229_p7 }
  0x22   : > { %p1819_p10 = pneg %p1818_p9 }
  0x24   : > { %p1826_p0 = pnand %p1825_p13, %p1819_p10 }
  0x26   : > { %1829 = shalt.err (!%p1826_p0)
}
  0x27   : > { %s2105_s18 = smov 64   ;;  %s2106_s19 = smov 4  }
  0x28   : > { %s2608_s3 = sld [smem:[#allocation28_spill]]  ;;  %s1841_s29 = scalar_lea.vmem %s367_s30, 16 }
  0x29   : > { %p1842_p2 = scmp.ne.s32.totalorder %s367_s30, %s1841_s29  ;;  %s1848_s14 = scalar_lea.vmem %s367_s30, 32 }
  0x2a   : > { %p1849_p9 = scmp.lt.s32.totalorder %s367_s30, %s367_s30  ;;  %p1850_p4 = scmp.lt.s32.totalorder %s1848_s14, %s1841_s29 }
  0x2b   : > { %p1844_p5 = pnand %p1842_p2, %p2229_p7 }
  0x2c   : > { %p1851_p11 = por %p1850_p4, %p1849_p9 }
  0x2d   : > { %p1845_p8 = pneg %p1844_p5 }
  0x2e   : > { %1695 = dma.hbm_to_vmem [thread:$0]  (!%p2221_p6), %s2608_s3, 256, %s353_s26, [#allocation7], %s2105_s18, %s2105_s18, %s2106_s19  }
  0x2f   : > { %p1852_p10 = pnand %p1851_p11, %p1845_p8 }
  0x31   : > { %1855 = shalt.err (!%p1852_p10)
}
  0x32   : > { %s2609_s4 = sld [smem:[#allocation29_spill]]  ;;  %s1867_s26 = scalar_lea.vmem %s2225_s15, 128 }
  0x33   : > { %p1868_p12 = scmp.ne.s32.totalorder %s2225_s15, %s1867_s26  ;;  %p1875_p2 = scmp.lt.s32.totalorder %s2225_s15, %s2225_s15 }
  0x34   : > { %p1876_p4 = scmp.lt.s32.totalorder %s1867_s26, %s1867_s26 }
  0x35   : > { %p1870_p13 = pnand %p1868_p12, %p2229_p7 }
  0x36   : > { %p1877_p5 = por %p1876_p4, %p1875_p2 }
  0x37   : > { %p1871_p0 = pneg %p1870_p13 }
  0x38   : > { %1698 = dma.hbm_to_vmem [thread:$0]  (!%p2221_p6), %s2609_s4, 16, %s367_s30, [#allocation10]  }
  0x39   : > { %p1878_p8 = pnand %p1877_p5, %p1871_p0 }
  0x3b   : > { %1881 = shalt.err (!%p1878_p8)
}
  0x3c   : > { %s2610_s7 = sld [smem:[#allocation31_spill]]  ;;  %s2107_s30 = smov [#allocation11]  }
  0x3d   : > { %s380_s25 = sshll.u32 %s2107_s30, 4  ;;  %s2108_s29 = smov [#allocation14]   ;;  %s381_s25 = int_to_ptr.vmem [resolvable:$true] %s380_s25 }
  0x3e   : > { %s404_s14 = sshll.u32 %s2108_s29, 4  ;;  %s1893_s17 = scalar_lea.vmem %s381_s25, 16  ;;  %s405_s14 = int_to_ptr.vmem [resolvable:$true] %s404_s14 }
  0x3f   : > { %p1894_p9 = scmp.ne.s32.totalorder %s381_s25, %s1893_s17  ;;  %s1900_s26 = scalar_lea.vmem %s381_s25, 32 }
  0x40   : > { %p1901_p12 = scmp.lt.s32.totalorder %s381_s25, %s381_s25  ;;  %p1902_p13 = scmp.lt.s32.totalorder %s1900_s26, %s1893_s17 }
  0x41   : > { %p1896_p11 = pnand %p1894_p9, %p2229_p7 }
  0x42   : > { %1704 = dma.hbm_to_vmem [thread:$0]  (!%p2221_p6), %s2610_s7, 128, %s2225_s15, [#allocation13], %s2105_s18, %s2105_s18, %s2106_s19  }
  0x43   : > { %p1897_p10 = pneg %p1896_p11  ;;  %p1903_p0 = por %p1902_p13, %p1901_p12 }
  0x45   : > { %p1904_p2 = pnand %p1903_p0, %p1897_p10 }
  0x47   : > { %1907 = shalt.err (!%p1904_p2)
}
  0x48   : > { %s2611_s6 = sld [smem:[#allocation30_spill]]  ;;  %s1919_s18 = scalar_lea.vmem %s405_s14, 16 }
  0x49   : > { %p1920_p4 = scmp.ne.s32.totalorder %s405_s14, %s1919_s18  ;;  %s1926_s19 = scalar_lea.vmem %s405_s14, 32 }
  0x4a   : > { %p1927_p9 = scmp.lt.s32.totalorder %s405_s14, %s405_s14  ;;  %p1928_p11 = scmp.lt.s32.totalorder %s1926_s19, %s1919_s18 }
  0x4b   : > { %p1922_p5 = pnand %p1920_p4, %p2229_p7 }
  0x4c   : > { %p1929_p1 = por %p1928_p11, %p1927_p9 }
  0x4d   : > { %p1923_p8 = pneg %p1922_p5 }
  0x4e   : > { %1701 = dma.hbm_to_vmem [thread:$0]  (!%p2221_p6), %s2611_s6, 16, %s381_s25, [#allocation10]  }
  0x4f   : > { %p1930_p12 = pnand %p1929_p1, %p1923_p8 }
  0x51   : > { %1933 = shalt.err (!%p1930_p12)
}
  0x52   : > { %s2612_s8 = sld [smem:[#allocation32_spill]]  ;;  %s1507_s16 = sadd.s32 4294967294, %s2100_s24  }
  0x53   : > { %s2275_s13 = sadd.s32 1, %s2100_s24   ;;  %s70_s25 = sadd.s32 1, %s2096_s23 }
  0x54   : > { %2613 = sst [smem:[#allocation26_spill]] %s2275_s13  ;;  %s67_s29 = ssub.s32 %s2100_s24, %s2275_s13 }
  0x55   : > { %p77_p1 = scmp.ne.s32.totalorder %s2096_s23, %s2092_s22  ;;  %p68_p7 = scmp.eq.s32.totalorder %s67_s29, 0 }
  0x56   : > { %p78_p10 = scmp.eq.s32.totalorder %s2100_s24, 0  ;;  %p83_p13 = scmp.ne.s32.totalorder %s2092_s22, %s2088_s21 }
  0x57   : > { %p301_p0 = scmp.eq.s32.totalorder %s2207_s27, 1  ;;  %p2615_p4 = scmp.eq.s32.totalorder %s2207_s27, 0 }
  0x58   : > { %1707 = dma.hbm_to_vmem [thread:$0]  (!%p2221_p6), %s2612_s8, 16, %s405_s14, [#allocation13]  }
  0x59   : > { %s2287_s17 = scalar_select %p68_p7, %s2096_s23, %s70_s25  }
  0x5a   : > { %p79_p2 = por %p78_p10, %p77_p1  ;;  %p2291_p5 = por %p2615_p4, %p83_p13 }
  0x5b   : > { %2614 = sst [smem:[#allocation27_spill]] %s2287_s17  ;;  %p2295_p6 = por %p301_p0, %p77_p1 }
  0x5c   : > { %s2616_s26 = scalar_select %p2291_p5, 1, 0 }
  0x5d   : > { %s2617_s14 = scalar_select %p2295_p6, 1, 0 }
  0x5e   : > { %p307_p8 = scmp.eq.s32.totalorder %s1507_s16, 1  ;;  %p1727_p9 = scmp.lt.s32.totalorder %s2100_s24, 2 }
  0x5f   : > { %s428_s11 = sand.u32 1, %s2096_s23   ;;  %s1516_s19 = sshll.u32 %s2100_s24, 7 }
  0x60   : > { %p2301_p11 = por %p307_p8, %p83_p13  ;;  %s2305_s18 = sshll.u32 %s428_s11, 3 }
  0x61   : > { %s2311_s25 = scalar_lea.hbm %s2578_s1, %s1516_s19  ;;  %s432_s29 = scalar_lea.vmem [#allocation3], %s2305_s18 }
  0x62   : > { %s2618_s15 = scalar_select %p2301_p11, 1, 0 }
  0x63   : > { %s439_s16 = sshll.u32 %s432_s29, 4  ;;  %p2314_p12 = pnand %p1727_p9, %p79_p2  ;;  %s440_s16 = int_to_ptr.vmem [resolvable:$true] %s439_s16 }
  0x64   : > { %s2321_s7 = scalar_lea.hbm %s2579_s2, %s1516_s19  ;;  %s429_s20 = scalar_lea.sflag [#allocation4], %s428_s11 }
  0x65   : > { %s1934_s30 = scalar_lea.hbm %s2311_s25, 128  ;;  %p1936_p7 = pneg %p2314_p12 }
  0x66   : > { %p1935_p1 = scmp.ne.s32.totalorder %s2311_s25, %s1934_s30  ;;  %s1939_s17 = scalar_lea.hbm %s2578_s1, 256 }
  0x67   : > { %p1940_p0 = scmp.lt.s32.totalorder %s2311_s25, %s2578_s1  ;;  %p1941_p2 = scmp.lt.s32.totalorder %s1939_s17, %s1934_s30 }
  0x68   : > { %p1937_p10 = pnand %p1936_p7, %p1935_p1 }
  0x69   : > { %p1942_p4 = por %p1941_p2, %p1940_p0 }
  0x6a   : > { %p1938_p13 = pneg %p1937_p10 }
  0x6c   : > { %p1943_p8 = pnand %p1942_p4, %p1938_p13 }
  0x6e   : > { %1946 = shalt.err (!%p1943_p8)
}
  0x6f   : > { %s1947_s4 = scalar_lea.vmem %s440_s16, 128  ;;  %s2109_s6 = smov [#allocation3]  }
  0x70   : > { %p1948_p9 = scmp.ne.s32.totalorder %s440_s16, %s1947_s4  ;;  %s1952_s11 = sshll.u32 %s2109_s6, 4  ;;  %s1953_s11 = int_to_ptr.vmem [resolvable:$false] %s1952_s11 }
  0x71   : > { %s1954_s8 = scalar_lea.vmem %s1953_s11, 256  ;;  %p1955_p10 = scmp.lt.s32.totalorder %s440_s16, %s1953_s11 }
  0x72   : > { %p1950_p11 = pnand %p1948_p9, %p1936_p7  ;;  %p1956_p6 = scmp.lt.s32.totalorder %s1954_s8, %s1947_s4 }
  0x74   : > { %p1951_p1 = pneg %p1950_p11  ;;  %p1957_p5 = por %p1956_p6, %p1955_p10 }
  0x76   : > { %p1958_p3 = pnand %p1957_p5, %p1951_p1 }
  0x78   : > { %1961 = shalt.err (!%p1958_p3)
}
  0x79   : > { %1711 = dma.hbm_to_vmem [thread:$0]  (!%p2314_p12), %s2311_s25, 128, %s440_s16, %s429_s20  }
  0x7a   : > { %s446_s23 = sand.u32 1, %s2100_s24   ;;  %s450_s13 = scalar_lea.vmem [#allocation6], %s2305_s18 }
  0x7b   : > { %s457_s17 = sshll.u32 %s450_s13, 4  ;;  %s447_s19 = scalar_lea.sflag [#allocation7], %s446_s23  ;;  %s458_s17 = int_to_ptr.vmem [resolvable:$true] %s457_s17 }
  0x7c   : > { %s1962_s30 = scalar_lea.hbm %s2321_s7, 128  ;;  %s1967_s6 = scalar_lea.hbm %s2579_s2, 256 }
  0x7d   : > { %p1963_p11 = scmp.ne.s32.totalorder %s2321_s7, %s1962_s30  ;;  %p1968_p6 = scmp.lt.s32.totalorder %s2321_s7, %s2579_s2 }
  0x7e   : > { %p1969_p13 = scmp.lt.s32.totalorder %s1967_s6, %s1962_s30 }
  0x7f   : > { %p1965_p3 = pnand %p1963_p11, %p1936_p7 }
  0x80   : > { %p1970_p0 = por %p1969_p13, %p1968_p6 }
  0x81   : > { %p1966_p5 = pneg %p1965_p3 }
  0x83   : > { %p1971_p2 = pnand %p1970_p0, %p1966_p5 }
  0x85   : > { %1974 = shalt.err (!%p1971_p2)
}
  0x86   : > { %s1975_s18 = scalar_lea.vmem %s458_s17, 128  ;;  %s2110_s25 = smov [#allocation6]  }
  0x87   : > { %p1976_p4 = scmp.ne.s32.totalorder %s458_s17, %s1975_s18  ;;  %s1980_s16 = sshll.u32 %s2110_s25, 4  ;;  %s1981_s16 = int_to_ptr.vmem [resolvable:$false] %s1980_s16 }
  0x88   : > { %s1982_s20 = scalar_lea.vmem %s1981_s16, 256  ;;  %p1983_p1 = scmp.lt.s32.totalorder %s458_s17, %s1981_s16 }
  0x89   : > { %p1978_p8 = pnand %p1976_p4, %p1936_p7  ;;  %p1984_p10 = scmp.lt.s32.totalorder %s1982_s20, %s1975_s18 }
  0x8b   : > { %p1979_p9 = pneg %p1978_p8  ;;  %p1985_p11 = por %p1984_p10, %p1983_p1 }
  0x8d   : > { %p1986_p3 = pnand %p1985_p11, %p1979_p9 }
  0x8f   : > { %1989 = shalt.err (!%p1986_p3)
}
  0x90   : > { %1714 = dma.hbm_to_vmem [thread:$0]  (!%p2314_p12), %s2321_s7, 128, %s458_s17, %s447_s19  }
  0x91   : > { %p2620_p5 = scmp.ne.s32.totalorder %s2605_s28, 0 }
  0x92   : > { %s2366_s23 = sand.u32 (!%p2620_p5), 1, %s2092_s22   ;;  %p2621_p7 = scmp.ne.s32.totalorder (!%p2620_p5), %s2616_s26, 0 }
  0x93   : > { %466 = sbr.rel (%p2620_p5) target bundleno = 1548 (0x60c), region = 64  ;;  %s2369_s13 = sshll.u32 (!%p2620_p5), %s2366_s23, 3 }
  0x94   : > { %s469_s30 = scalar_lea.sflag (!%p2620_p5), [#allocation4], %s2366_s23  ;;  %s472_s29 = scalar_lea.vmem (!%p2620_p5), [#allocation3], %s2369_s13 }
  0x98   : > { %2059 = dma.done.wait (%p2621_p7), %s469_s30, 128  }
  0x99   : > { %2061 = vsyncadd (%p2621_p7), %s469_s30, 4294967168  ;;  %s477_s3 = sand.u32 1, %s2207_s27   ;;  %s481_s28 = scalar_lea.vmem [#allocation6], %s2369_s13 }
  0x9a   : > { %s478_s7 = scalar_lea.sflag [#allocation7], %s477_s3 }
  0x9b   : > { %2063 = dma.done.wait (%p2621_p7), %s478_s7, 128  }
  0x9c   : > { %2065 = vsyncadd (%p2621_p7), %s478_s7, 4294967168  ;;  %p2622_p12 = scmp.eq.s32.totalorder %s2207_s27, 0 }
  0x9e   : > { %2067 = dma.done.wait (%p2622_p12), [#allocation7], 256   ;;  %p2623_p6 = pmov %p2622_p12 }
  0xa0   : > { %2069 = vsyncadd (%p2623_p6), [#allocation7], 4294967040  ;;  %p2624_p13 = pmov %p2623_p6 }
  0xa1   : > { %p2625_p0 = pmov %p2623_p6 }
  0xa2   : > { %2071 = dma.done.wait (%p2624_p13), [#allocation10], 32  }
  0xa3   : > { %2073 = vsyncadd (%p2625_p0), [#allocation10], 4294967264  ;;  %p2626_p2 = pmov %p2625_p0 }
  0xa4   : > { %p2627_p4 = pmov %p2625_p0 }
  0xa5   : > { %2075 = dma.done.wait (%p2626_p2), [#allocation13], 144  }
  0xa6   : > { %2077 = vsyncadd (%p2627_p4), [#allocation13], 4294967152  ;;  %p556_p8 = scmp.lt.s32.totalorder %s2207_s27, 1  ;;  %v2111_v0 = vmov 0.0   ;;  %vm2112_vm0 = vmmov 0   ;;  %v1781_v1 = vld [vmem:[#allocation8 + $0x8] sm:$0xff]  }
  0xa7   : > { %1586 = vmatprep.subr.bf16.mxu0 %v2111_v0  ;;  %1590 = vmatprep.mubr.msk.bf16.mxu0 %vm2112_vm0, %v2111_v0  ;;  %v1782_v2 = vld [vmem:[#allocation8] sm:$0xff]   ;;  %vm590_vm1 = vcmask 261120   ;;  %v1783_v4 = vld [vmem:[#allocation12] sm:$0xff]   ;;  %vm715_vm2 = vcmask 130048   ;;  %v1530_v12 = vld [vmem:[#allocation9] ss:$0 sm:$0xff] }
  0xa8   : > { %s557_s26 = scalar_select %p556_p8, %s2207_s27, 1  ;;  %1594 = vmatprep.subr.bf16.mxu1 %v2111_v0  ;;  %1598 = vmatprep.mubr.msk.bf16.mxu1 %vm2112_vm0, %v2111_v0  ;;  %v1784_v5 = vld [vmem:[%s2582_s5 + $0x8] sm:$0xff]   ;;  %v565_v7 = vld [vmem:[%s481_s28] sm:$0xff]  ;;  %vm763_vm3 = vcmask 64512   ;;  %vm826_vm4 = vcmask 1043456   ;;  %vm988_vm5 = vcmask 130112  }
  0xa9   : > { %1587 = vmatpush3.bf16.msra.mxu0 %v1781_v1  ;;  %1595 = vmatpush3.bf16.msra.mxu1 %v1784_v5  ;;  %v566_v8 = vpack.c.bf16 %v565_v7, %v565_v7  ;;  %v1785_v9 = vld [vmem:[%s2582_s5] sm:$0xff]   ;;  %v563_v10 = vld [vmem:[%s472_s29] sm:$0xff]  ;;  %s2113_s16 = smov 112   ;;  %s2114_s20 = smov 120   ;;  %v1534_v31 = vld [vmem:[#allocation11] ss:$0 sm:$0xff] }
  0xaa   : > { %s1529_s17 = sshll.u32 %s557_s26, 3  ;;  %1588 = vmatprep.subr.bf16.mxu0 %v2111_v0  ;;  %1596 = vmatprep.subr.bf16.mxu1 %v2111_v0  ;;  %v564_v11 = vpack.c.bf16 %v563_v10, %v563_v10  ;;  %v1538_v20 = vld [vmem:[#allocation14] ss:$0 sm:$0xff]  ;;  %s2115_s30 = smov 104   ;;  %vm1104_vm6 = vcmask 195712   ;;  %vm1220_vm7 = vcmask 261312  }
  0xab   : > { %s559_s6 = scalar_lea.vmem %s2577_s0, %s1529_s17  ;;  %s555_s29 = scalar_lea.vmem [#allocation16], %s2369_s13 }
  0xac   : > { %v561_v3 = vld [vmem:[%s559_s6] sm:$0xff]  ;;  %s2116_s3 = smov 8   ;;  %s2117_s19 = smov 16  }
  0xad   : > { %v562_v6 = vpack.c.bf16 %v561_v3, %v561_v3  ;;  %1589 = vmatpush3.bf16.msra.mxu0 %v1782_v2  ;;  %1597 = vmatpush3.bf16.msra.mxu1 %v1785_v9  ;;  %s2118_s4 = smov 24   ;;  %s1555_s6 = sshll.u32 %s2207_s27, 7 }
  0xae   : > { %1602 = vmatprep.subr.bf16.mxu0 %v2111_v0  ;;  %1608 = vmatprep.subr.bf16.mxu1 %v2111_v0  ;;  %s1321_s18 = scalar_lea.hbm %s2589_s12, %s1555_s6  ;;  %s1323_s25 = sshll.u32 %s555_s29, 4  ;;  %s1324_s25 = int_to_ptr.vmem [resolvable:$true] %s1323_s25 }
  0xaf   : > { %p2628_p1 = scmp.ne.s32.totalorder %s2617_s14, 0 }
  0xb0   : > { %1591 = vmatmul.mubr.msk.bf16.vlgmr.msra.gmra.mxu0 %vm590_vm1, %v562_v6  ;;  %1599 = vmatmul.mubr.msk.bf16.vlgmr.msra.gmra.mxu1 %vm590_vm1, %v564_v11 }
  0xb1   : > { %1603 = vmatpush3.bf16.msra.mxu0 %v1783_v4  ;;  %1604 = vmatprep.mubr.msk.bf16.mxu0 %vm2112_vm0, %v2111_v0 }
  0xb2   : > { %1614 = vmatprep.subr.bf16.mxu0 %v2111_v0  ;;  %1610 = vmatprep.mubr.msk.bf16.mxu1 %vm2112_vm0, %v2111_v0 }
  0xb8   : > { %1605 = vmatmul.mubr.msk.bf16.vlgmr.msra.gmra.mxu0 %vm715_vm2, %v566_v8 }
  0xb9   : > { %1616 = vmatprep.mubr.msk.bf16.mxu0 %vm2112_vm0, %v2111_v0 }
 0x170   : > { %v628_v13 = vpop.f32.mrf.mxu0  ;;  %v694_v28 = vpop.f32.mrf.mxu1 }
 0x171   : > { %v629_v14 = vadd.f32 %v1530_v12, %v628_v13  ;;  %v695_v33 = vadd.f32 %v1534_v31, %v694_v28 }
 0x172   : > { %v1592_v15 = vpop.f32.mrf.mxu0  ;;  %v1600_v29 = vpop.f32.mrf.mxu1 }
 0x173   : > { %v761_v16 = vpack.c.bf16 %v629_v14, %v629_v14  ;;  %v2441_v34 = vpack.c.bf16 %v695_v33, %v695_v33 }
 0x174   : > { %v631_v17 = vpop.f32.mrf.mxu0  ;;  %v697_v30 = vpop.f32.mrf.mxu1 }
 0x175   : > { %992 = vrot.lane.b32.xlu1 %v761_v16, %s2113_s16  ;;  %875 = vrot.lane.b32.xlu0 %v761_v16, %s2114_s20  ;;  %v768_v18 = vsel %vm763_vm3, %v761_v16, 0  ;;  %v828_v35 = vsel %vm826_vm4, %v2441_v34, 0 }
 0x176   : > { %v1593_v19 = vpop.f32.mrf.mxu0  ;;  %1609 = vmatpush3.bf16.xpose.msra.mxu1 %v768_v18  ;;  %v1601_v32 = vpop.f32.mrf.mxu1  ;;  %1615 = vmatpush3.bf16.msra.mxu0 %v828_v35 }
 0x177   : > { %1620 = vmatprep.subr.bf16.mxu1 %v2111_v0  ;;  %1626 = vmatprep.subr.bf16.mxu0 %v2111_v0 }
 0x178   : > { %v753_v21 = vpop.f32.mrf.mxu0 }
 0x179   : > { %v754_v22 = vadd.f32 %v1538_v20, %v753_v21 }
 0x17a   : > { %v1606_v23 = vpop.f32.mrf.mxu0 }
 0x17b   : > { %v759_v24 = vmul.f32 0.35355338, %v754_v22 }
 0x17c   : > { %v756_v25 = vpop.f32.mrf.mxu0 }
 0x17d   : > { %v760_v26 = vpack.c.bf16 %v759_v24, %v759_v24 }
 0x17e   : > { %v1607_v27 = vpop.f32.mrf.mxu0 }
 0x17f   : > { %990 = vrot.lane.b32.xlu1 %v760_v26, %s2113_s16  ;;  %872 = vrot.lane.b32.xlu0 %v760_v26, %s2114_s20 }
 0x180   : > { %1611 = vmatmul.mubr.msk.bf16.vlgmr.msra.gmra.mxu1 %vm763_vm3, %v760_v26 }
 0x181   : > { %1622 = vmatprep.mubr.msk.bf16.mxu1 %vm2112_vm0, %v2111_v0 }
 0x183   : > { %1106 = vrot.lane.b32.xlu1 %v760_v26, %s2115_s30  ;;  %1108 = vrot.lane.b32.xlu0 %v761_v16, %s2115_s30 }
 0x1e7   : > { %v876_v36 = vpop.permute.xlu0 %875  ;;  %v993_v38 = vpop.permute.xlu1 %992 }
 0x1e8   : > { %v881_v37 = vsel %vm763_vm3, %v876_v36, 0  ;;  %v998_v40 = vsel %vm763_vm3, %v993_v38, 0 }
 0x1e9   : > { %1621 = vmatpush3.bf16.xpose.msra.mxu1 %v881_v37 }
 0x1ea   : > { %1632 = vmatprep.subr.bf16.mxu1 %v2111_v0 }
 0x1f1   : > { %v873_v39 = vpop.permute.xlu0 %872  ;;  %v991_v42 = vpop.permute.xlu1 %990 }
 0x1f2   : > { %1623 = vmatmul.mubr.msk.bf16.vlgmr.msra.gmra.mxu1 %vm763_vm3, %v873_v39 }
 0x1f3   : > { %1633 = vmatpush3.bf16.xpose.msra.mxu1 %v998_v40  ;;  %1634 = vmatprep.mubr.msk.bf16.mxu1 %vm2112_vm0, %v2111_v0 }
 0x1f4   : > { %1644 = vmatprep.subr.bf16.mxu1 %v2111_v0 }
 0x1f5   : > { %v1109_v41 = vpop.permute.xlu0 %1108  ;;  %v1107_v44 = vpop.permute.xlu1 %1106 }
 0x1f6   : > { %v1114_v43 = vsel %vm763_vm3, %v1109_v41, 0 }
 0x1fa   : > { %1635 = vmatmul.mubr.msk.bf16.vlgmr.msra.gmra.mxu1 %vm763_vm3, %v991_v42 }
 0x1fb   : > { %1645 = vmatpush3.bf16.xpose.msra.mxu1 %v1114_v43  ;;  %1646 = vmatprep.mubr.msk.bf16.mxu1 %vm2112_vm0, %v2111_v0 }
 0x1fc   : > { %1656 = vmatprep.subr.bf16.mxu1 %v2111_v0 }
 0x202   : > { %1647 = vmatmul.mubr.msk.bf16.vlgmr.msra.gmra.mxu1 %vm763_vm3, %v1107_v44 }
 0x203   : > { %1660 = vmatprep.mubr.msk.bf16.mxu1 %vm2112_vm0, %v2111_v0 }
 0x240   : > { %v804_v45 = vpop.f32.mrf.mxu1 }
 0x241   : > { %810 = vst.msk [vmem:[%s555_s29] sm:$0xff] %vm763_vm3, %v804_v45  ;;  %v811_v46 = vsel %vm763_vm3, %v804_v45, -inf }
 0x242   : > { %812 = vmax.xlane.f32.xlu0 %v811_v46  ;;  %v1612_v47 = vpop.f32.mrf.mxu1 }
 0x244   : > { %v807_v48 = vpop.f32.mrf.mxu1 }
 0x246   : > { %v1613_v49 = vpop.f32.mrf.mxu1 }
 0x2b2   : > { %v917_v50 = vpop.f32.mrf.mxu1 }
 0x2b3   : > { %v923_v51 = vsel %vm763_vm3, %v917_v50, -inf }
 0x2b4   : > { %924 = vmax.xlane.f32.xlu1 %v923_v51  ;;  %v1624_v52 = vpop.f32.mrf.mxu1  ;;  %v1786_v51 = vld [vmem:[%s2586_s9 + $0x8] sm:$0xff]  }
 0x2b5   : > { %1657 = vmatpush3.bf16.msra.mxu1 %v1786_v51 }
 0x2b6   : > { %v920_v53 = vpop.f32.mrf.mxu1  ;;  %1658 = vmatprep.subr.bf16.mxu1 %v2111_v0 }
 0x2b7   : > { %v1787_v53 = vld [vmem:[%s2586_s9] sm:$0xff]  }
 0x2b8   : > { %v1625_v54 = vpop.f32.mrf.mxu1 }
 0x2b9   : > { %1659 = vmatpush3.bf16.msra.mxu1 %v1787_v53 }
 0x2ba   : > { %v1034_v55 = vpop.f32.mrf.mxu1 }
 0x2bb   : > { %v1040_v56 = vsel %vm763_vm3, %v1034_v55, -inf }
 0x2bc   : > { %1041 = vmax.xlane.f32.xlu0 %v1040_v56  ;;  %v1636_v57 = vpop.f32.mrf.mxu1 }
 0x2be   : > { %v1037_v58 = vpop.f32.mrf.mxu1 }
 0x2c0   : > { %v1637_v59 = vpop.f32.mrf.mxu1 }
 0x2c2   : > { %v1150_v60 = vpop.f32.mrf.mxu1 }
 0x2c3   : > { %v1156_v61 = vsel %vm763_vm3, %v1150_v60, -inf }
 0x2c4   : > { %1157 = vmax.xlane.f32.xlu0 %v1156_v61  ;;  %v1648_v62 = vpop.f32.mrf.mxu1 }
 0x2c6   : > { %v1153_v63 = vpop.f32.mrf.mxu1 }
 0x2c8   : > { %v1649_v1 = vpop.f32.mrf.mxu1 }
 0x2cb   : > { %v813_v2 = vpop.xlane.xlu0 %812 }
 0x2cc   : > { %v814_v3 = vsub.f32 %v804_v45, %v813_v2 }
 0x2ce   : > { %v815_v4 = vmul.f32 1.442695, %v814_v3 }
 0x2d0   : > { %1788 = vpow2.f32 %v815_v4 }
 0x2dd   : > { %v1789_v5 = vpop.eup %1788 }
 0x2de   : > { %v817_v6 = vsel %vm763_vm3, %v1789_v5, 0.0 }
 0x2df   : > { %818 = vadd.xlane.f32.xlu1 %v817_v6 }
 0x2f0   : > { %936 = vrot.lane.b32.xlu1 %v2441_v34, %s2114_s20  ;;  %s1990_s20 = scalar_lea.vmem %s1324_s25, 128 }
 0x2f1   : > { %p1991_p9 = scmp.ne.s32.totalorder %s1324_s25, %s1990_s20 }
 0x2f3   : > { %p1992_p10 = pnand %p1991_p9, %p2628_p1 }
 0x2f5   : > { %p1993_p11 = pneg %p1992_p10 }
 0x33d   : > { %v925_v7 = vpop.xlane.xlu1 %924 }
 0x33e   : > { %v926_v8 = vsub.f32 %v917_v50, %v925_v7 }
 0x340   : > { %v927_v9 = vmul.f32 1.442695, %v926_v8 }
 0x342   : > { %1790 = vpow2.f32 %v927_v9 }
 0x345   : > { %v1042_v10 = vpop.xlane.xlu0 %1041 }
 0x346   : > { %v1043_v11 = vsub.f32 %v1034_v55, %v1042_v10 }
 0x348   : > { %v1044_v12 = vmul.f32 1.442695, %v1043_v11 }
 0x34a   : > { %1792 = vpow2.f32 %v1044_v12 }
 0x34d   : > { %v1158_v13 = vpop.xlane.xlu0 %1157 }
 0x34e   : > { %v1159_v14 = vsub.f32 %v1150_v60, %v1158_v13 }
 0x34f   : > { %v1791_v15 = vpop.eup %1790 }
 0x350   : > { %v1160_v16 = vmul.f32 1.442695, %v1159_v14  ;;  %v929_v17 = vsel %vm763_vm3, %v1791_v15, 0.0 }
 0x351   : > { %930 = vadd.xlane.f32.xlu0 %v929_v17 }
 0x352   : > { %1794 = vpow2.f32 %v1160_v16 }
 0x357   : > { %v1793_v18 = vpop.eup %1792 }
 0x358   : > { %v1046_v19 = vsel %vm763_vm3, %v1793_v18, 0.0 }
 0x359   : > { %1047 = vadd.xlane.f32.xlu1 %v1046_v19 }
 0x35f   : > { %v1795_v20 = vpop.eup %1794 }
 0x360   : > { %v1162_v21 = vsel %vm763_vm3, %v1795_v20, 0.0 }
 0x361   : > { %1163 = vadd.xlane.f32.xlu0 %v1162_v21 }
 0x368   : > { %v819_v22 = vpop.xlane.xlu1 %818 }
 0x369   : > { %1796 = vrcp.f32 %v819_v22 }
 0x36a   : > { %1168 = vrot.lane.b32.xlu1 %v2441_v34, %s2115_s30  ;;  %s2119_s30 = smov [#allocation16]  }
 0x36c   : > { %v937_v25 = vpop.permute.xlu1 %936 }
 0x36d   : > { %v942_v27 = vsel %vm826_vm4, %v937_v25, 0 }
 0x376   : > { %v1797_v23 = vpop.eup %1796 }
 0x377   : > { %1052 = vrot.lane.b32.xlu0 %v2441_v34, %s2113_s16  ;;  %v821_v24 = vmul.f32 %v1797_v23, %v1789_v5  ;;  %s1297_s16 = scalar_lea.sflag [#allocation17], %s2366_s23 }
 0x379   : > { %v822_v26 = vpack.c.bf16 %v821_v24, %v821_v24 }
 0x37b   : > { %1617 = vmatmul.mubr.msk.bf16.vlgmr.msra.gmra.mxu0 %vm763_vm3, %v822_v26 }
 0x37c   : > { %1627 = vmatpush3.bf16.msra.mxu0 %v942_v27  ;;  %1628 = vmatprep.mubr.msk.bf16.mxu0 %vm2112_vm0, %v2111_v0 }
 0x37d   : > { %1638 = vmatprep.subr.bf16.mxu0 %v2111_v0 }
 0x3da   : > { %v931_v28 = vpop.xlane.xlu0 %930 }
 0x3db   : > { %1798 = vrcp.f32 %v931_v28 }
 0x3e2   : > { %v1048_v29 = vpop.xlane.xlu1 %1047 }
 0x3e3   : > { %1800 = vrcp.f32 %v1048_v29 }
 0x3e6   : > { %v1169_v38 = vpop.permute.xlu1 %1168 }
 0x3e7   : > { %v1174_v40 = vsel %vm826_vm4, %v1169_v38, 0 }
 0x3e8   : > { %v1799_v30 = vpop.eup %1798 }
 0x3e9   : > { %v933_v31 = vmul.f32 %v1799_v30, %v1791_v15 }
 0x3ea   : > { %v1164_v32 = vpop.xlane.xlu0 %1163 }
 0x3eb   : > { %1802 = vrcp.f32 %v1164_v32  ;;  %v934_v33 = vpack.c.bf16 %v933_v31, %v933_v31 }
 0x3ed   : > { %1629 = vmatmul.mubr.msk.bf16.vlgmr.msra.gmra.mxu0 %vm763_vm3, %v934_v33 }
 0x3ee   : > { %v1053_v34 = vpop.permute.xlu0 %1052  ;;  %1640 = vmatprep.mubr.msk.bf16.mxu0 %vm2112_vm0, %v2111_v0 }
 0x3ef   : > { %v1058_v35 = vsel %vm826_vm4, %v1053_v34, 0 }
 0x3f0   : > { %v1801_v36 = vpop.eup %1800  ;;  %1639 = vmatpush3.bf16.msra.mxu0 %v1058_v35 }
 0x3f1   : > { %1650 = vmatprep.subr.bf16.mxu0 %v2111_v0  ;;  %v1050_v37 = vmul.f32 %v1801_v36, %v1793_v18 }
 0x3f3   : > { %v1051_v39 = vpack.c.bf16 %v1050_v37, %v1050_v37 }
 0x3f5   : > { %1641 = vmatmul.mubr.msk.bf16.vlgmr.msra.gmra.mxu0 %vm763_vm3, %v1051_v39 }
 0x3f6   : > { %1651 = vmatpush3.bf16.msra.mxu0 %v1174_v40  ;;  %1652 = vmatprep.mubr.msk.bf16.mxu0 %vm2112_vm0, %v2111_v0 }
 0x3f8   : > { %v1803_v41 = vpop.eup %1802 }
 0x3f9   : > { %v1166_v42 = vmul.f32 %v1803_v41, %v1795_v20 }
 0x3fb   : > { %v1167_v43 = vpack.c.bf16 %v1166_v42, %v1166_v42 }
 0x3fd   : > { %1653 = vmatmul.mubr.msk.bf16.vlgmr.msra.gmra.mxu0 %vm763_vm3, %v1167_v43 }
 0x43b   : > { %v864_v44 = vpop.f32.mrf.mxu0 }
 0x43c   : > { %870 = vst.msk [vmem:[#allocation2] sm:$0xff] %vm763_vm3, %v864_v44 }
 0x43d   : > { %v1618_v45 = vpop.f32.mrf.mxu0 }
 0x43f   : > { %v867_v46 = vpop.f32.mrf.mxu0 }
 0x441   : > { %v1619_v47 = vpop.f32.mrf.mxu0 }
 0x4ad   : > { %v978_v48 = vpop.f32.mrf.mxu0 }
 0x4ae   : > { %985 = vrot.lane.b32.xlu1 %v978_v48, %s2116_s3  ;;  %s1994_s3 = sshll.u32 %s2119_s30, 4  ;;  %s1995_s3 = int_to_ptr.vmem [resolvable:$false] %s1994_s3 }
 0x4af   : > { %v1630_v49 = vpop.f32.mrf.mxu0  ;;  %s1996_s7 = scalar_lea.vmem %s1995_s3, 256  ;;  %p1997_p3 = scmp.lt.s32.totalorder %s1324_s25, %s1995_s3 }
 0x4b0   : > { %p1998_p5 = scmp.lt.s32.totalorder %s1996_s7, %s1990_s20 }
 0x4b1   : > { %v981_v50 = vpop.f32.mrf.mxu0 }
 0x4b2   : > { %p1999_p7 = por %p1998_p5, %p1997_p3 }
 0x4b3   : > { %v1631_v52 = vpop.f32.mrf.mxu0 }
 0x4b4   : > { %p2000_p12 = pnand %p1999_p7, %p1993_p11 }
 0x4b5   : > { %v1094_v54 = vpop.f32.mrf.mxu0 }
 0x4b6   : > { %1101 = vrot.lane.b32.xlu0 %v1094_v54, %s2117_s19 }
 0x4b7   : > { %v1642_v55 = vpop.f32.mrf.mxu0 }
 0x4b9   : > { %v1097_v56 = vpop.f32.mrf.mxu0 }
 0x4bb   : > { %v1643_v57 = vpop.f32.mrf.mxu0 }
 0x4bd   : > { %v1210_v58 = vpop.f32.mrf.mxu0 }
 0x4be   : > { %1217 = vrot.lane.b32.xlu1 %v1210_v58, %s2118_s4 }
 0x4bf   : > { %v1654_v59 = vpop.f32.mrf.mxu0 }
 0x4c1   : > { %v1213_v60 = vpop.f32.mrf.mxu0 }
 0x4c3   : > { %v1655_v61 = vpop.f32.mrf.mxu0 }
 0x520   : > { %v986_v62 = vpop.permute.xlu1 %985 }
 0x521   : > { %989 = vst.msk [vmem:[#allocation2] sm:$0xff] %vm988_vm5, %v986_v62 }
 0x528   : > { %v1102_v0 = vpop.permute.xlu0 %1101 }
 0x529   : > { %1105 = vst.msk [vmem:[#allocation2] sm:$0xff] %vm1104_vm6, %v1102_v0 }
 0x530   : > { %v1218_v63 = vpop.permute.xlu1 %1217 }
 0x531   : > { %1221 = vst.msk [vmem:[#allocation2] sm:$0xff] %vm1220_vm7, %v1218_v63 }
 0x538   : > { %v1222_v1 = vld [vmem:[#allocation2] sm:$0xff] }
 0x539   : > { %v1223_v2 = vpack.c.bf16 %v1222_v1, %v1222_v1 }
 0x53b   : > { %1661 = vmatmul.mubr.msk.bf16.vlgmr.msra.gmra.mxu1 %vm590_vm1, %v1223_v2 }
 0x53c   : > { %2003 = shalt.err (!%p2000_p12)
}
 0x53d   : > { %s2004_s28 = scalar_lea.hbm %s1321_s18, 128  ;;  %s2008_s17 = scalar_lea.hbm %s2589_s12, 256 }
 0x53e   : > { %p2005_p6 = scmp.ne.s32.totalorder %s1321_s18, %s2004_s28  ;;  %p2009_p2 = scmp.lt.s32.totalorder %s1321_s18, %s2589_s12 }
 0x53f   : > { %p2010_p4 = scmp.lt.s32.totalorder %s2008_s17, %s2004_s28 }
 0x540   : > { %p2006_p13 = pnand %p2005_p6, %p2628_p1 }
 0x541   : > { %p2011_p8 = por %p2010_p4, %p2009_p2 }
 0x542   : > { %p2007_p0 = pneg %p2006_p13 }
 0x544   : > { %p2012_p9 = pnand %p2011_p8, %p2007_p0 }
 0x546   : > { %2015 = shalt.err (!%p2012_p9)
}
 0x547   : > { %1689 = dma.vmem_to_hbm [thread:$0]  (%p2628_p1), %s1324_s25, 128, %s1321_s18, %s1297_s16   ;;  %v1549_v3 = vld [vmem:[%s2587_s10] ss:$0 sm:$0xff] }
 0x548   : > { %s548_s20 = scalar_lea.vmem [#allocation15], %s2369_s13  ;;  %s2629_s28 = sld [smem:[#allocation33_spill]] }
 0x549   : > { %s1310_s30 = sshll.u32 %s548_s20, 4  ;;  %s1292_s18 = scalar_lea.sflag [#allocation5], %s2366_s23  ;;  %s2535_s30 = int_to_ptr.vmem [resolvable:$true] %s1310_s30 }
 0x54a   : > { %s2016_s13 = scalar_lea.vmem %s2535_s30, 128  ;;  %s2120_s27 = smov [#allocation15]  }
 0x54b   : > { %p2017_p10 = scmp.ne.s32.totalorder %s2535_s30, %s2016_s13  ;;  %s2020_s25 = sshll.u32 %s2120_s27, 4  ;;  %s2021_s25 = int_to_ptr.vmem [resolvable:$false] %s2020_s25 }
 0x54c   : > { %p2023_p5 = scmp.lt.s32.totalorder %s2535_s30, %s2021_s25 }
 0x54d   : > { %p2018_p11 = pnand %p2017_p10, %p2628_p1 }
 0x54e   : > { %s2533_s29 = scalar_lea.hbm %s2629_s28, %s1555_s6  ;;  %s2022_s6 = scalar_lea.vmem %s2021_s25, 256 }
 0x54f   : > { %p2019_p3 = pneg %p2018_p11  ;;  %p2024_p7 = scmp.lt.s32.totalorder %s2022_s6, %s2016_s13 }
 0x551   : > { %p2025_p12 = por %p2024_p7, %p2023_p5 }
 0x553   : > { %p2026_p6 = pnand %p2025_p12, %p2019_p3 }
 0x5fb   : > { %v1284_v4 = vpop.f32.mrf.mxu1 }
 0x5fc   : > { %v1285_v5 = vadd.f32 %v1549_v3, %v1284_v4 }
 0x5fd   : > { %v1662_v6 = vpop.f32.mrf.mxu1 }
 0x5fe   : > { %1290 = vst.msk [vmem:[%s548_s20] sm:$0xff] %vm715_vm2, %v1285_v5 }
 0x5ff   : > { %v1287_v7 = vpop.f32.mrf.mxu1 }
 0x600   : > { %2029 = shalt.err (!%p2026_p6)
}
 0x601   : > { %s2030_s16 = scalar_lea.hbm %s2533_s29, 128  ;;  %s2034_s17 = scalar_lea.hbm %s2629_s28, 256 }
 0x602   : > { %p2031_p13 = scmp.ne.s32.totalorder %s2533_s29, %s2030_s16  ;;  %p2035_p4 = scmp.lt.s32.totalorder %s2533_s29, %s2629_s28 }
 0x603   : > { %p2036_p8 = scmp.lt.s32.totalorder %s2034_s17, %s2030_s16 }
 0x604   : > { %p2032_p0 = pnand %p2031_p13, %p2628_p1 }
 0x605   : > { %p2037_p9 = por %p2036_p8, %p2035_p4 }
 0x606   : > { %p2033_p2 = pneg %p2032_p0 }
 0x608   : > { %p2038_p10 = pnand %p2037_p9, %p2033_p2 }
 0x60a   : > { %2041 = shalt.err (!%p2038_p10)
}
 0x60b   : > { %1688 = dma.vmem_to_hbm [thread:$0]  (%p2628_p1), %s2535_s30, 128, %s2533_s29, %s1292_s18   ;;  %v1663_v8 = vpop.f32.mrf.mxu1 }
 0x60c PF: > { %s1335_s11 = sand.u32 1, %s2088_s21   ;;  %p2630_p11 = scmp.ne.s32.totalorder %s2618_s15, 0 }
 0x60d   : > { %p2631_p3 = scmp.ge.s32.totalorder %s2100_s24, 2  ;;  %s1336_s8 = scalar_lea.sflag [#allocation5], %s1335_s11 }
 0x60f   : > { %p1716_p5 = pnand %p2631_p3, %p2630_p11 }
 0x611   : > { %p1717_p7 = pneg %p1716_p5 }
 0x613   : > { %2079 = dma.done.wait (%p1717_p7), %s1336_s8, 128  }
 0x614   : > { %2081 = vsyncadd (%p1717_p7), %s1336_s8, 4294967168  ;;  %s1345_s20 = scalar_lea.sflag [#allocation17], %s1335_s11 }
 0x615   : > { %2083 = dma.done.wait (%p1717_p7), %s1345_s20, 128  }
 0x616   : > { %2085 = vsyncadd (%p1717_p7), %s1345_s20, 4294967168  ;;  %s2632_s24 = sld [smem:[#allocation26_spill]]  ;;  %s2635_s21 = smov %s2092_s22 }
 0x617   : > { %s2633_s14 = sld [smem:[#allocation25_spill]] }
 0x618   : > { %s2634_s23 = sld [smem:[#allocation27_spill]] }
 0x61c   : > { %p34_p1 = scmp.ge.s32.totalorder %s2632_s24, 4  }
 0x61d   : > { %s2636_s22 = smov %s2633_s14 }
 0x61e   :  { %36 = sbr.rel (!%p34_p1) target bundleno = 18 (0x12), region = 162 }
 0x623   :  { %1350 = vsyncpa [#allocation4], 1 }
 0x624   :  { %1352 = vsyncpa [#allocation4 + $0x1], 1 }
 0x625   :  { %1353 = vsyncpa [#allocation7], 1 }
 0x626   :  { %1355 = vsyncpa [#allocation7 + $0x1], 1 }
 0x627   :  { %1356 = vsyncpa [#allocation10], 1 }
 0x628   :  { %1357 = vsyncpa [#allocation13], 1 }
 0x629   :  { %1358 = vsyncpa [#allocation5], 1 }
 0x62a   :  { %1360 = vsyncpa [#allocation5 + $0x1], 1 }
 0x62b   :  { %1361 = vsyncpa [#allocation17], 1 }
 0x62c   :  { %1363 = vsyncpa [#allocation17 + $0x1], 1 }

</bundles_post_ra>
